<compile_context>
chip_gen: v7x
topology: tpu7x:2x2x1
jax: 0.10.0
libtpu: 0.0.40
codegen_flags: <defaults>
</compile_context>

<pallas_src>
import math

import jax
import jax.numpy as jnp
from jax.experimental import pallas as pl
from jax.experimental.pallas import tpu as pltpu


def _dsw_matmul_kernel(x_ref, w_ref, o_ref):
    # x_ref : (tm, K)  VMEM tile   (K = g*seg_len, lane-dense)
    # w_ref : (K, N)   block-diagonal weight, resident across grid
    # o_ref : (tm, N)  N = g*d_model, lane-dense output
    o_ref[...] = jnp.dot(
        x_ref[...], w_ref[...], preferred_element_type=jnp.float32
    ).astype(o_ref.dtype)


def _round_up(v, m):
    return ((v + m - 1) // m) * m


def _vmem_capacity_bytes():
    # v5e/v6e: 128 MiB, v7x: 64 MiB.  Query when possible, fall back to the
    # conservative 64 MiB which is safe on every generation.
    try:
        return int(pltpu.get_tpu_info().vmem_capacity_bytes)
    except Exception:
        return 64 * 1024 * 1024


def _choose_group(seg_len, seg_num, d_model, max_k=1024, max_n=2048):
    """Pick g (segments packed per matmul row) minimizing lane padding of K and N."""
    best_g, best_score = 1, None
    for g in range(1, seg_num + 1):
        if seg_num % g:
            continue
        K = g * seg_len
        N = g * d_model
        if g > 1 and (K > max_k or N > max_n):
            break
        lane_pad = ((-K) % 128) + ((-N) % 128)   # wasted lanes per row (input + output)
        score = (lane_pad, K)                    # least padding first, then smallest K
        if best_score is None or score < best_score:
            best_g, best_score = g, score
    return best_g


def dsw_embedding_forward(x, w_linear, seg_len, d_model, *, tm_target=6144):
    """x: (batch, ts_len, ts_dim); w_linear: (d_model, seg_len) (nn.Linear layout, no bias)."""
    batch, ts_len, ts_dim = x.shape
    assert ts_len % seg_len == 0
    seg_num = ts_len // seg_len
    itemsize = jnp.dtype(x.dtype).itemsize

    # --- segment grouping for lane density ---------------------------------
    g = _choose_group(seg_len, seg_num, d_model)
    num_groups = seg_num // g
    K = g * seg_len                                  # contraction dim per row
    N = g * d_model                                  # output dim per row

    # --- layout plumbing (one last-two-axes swap + free reshapes) -----------
    # 'b (seg_num seg_len) d' -> (b, d, ts_len) -> (b*d*num_groups, g*seg_len)
    x_t = jnp.swapaxes(x, 1, 2)                      # (b, d, ts_len)
    M2 = batch * ts_dim * num_groups
    x2d = x_t.reshape(M2, K)

    # Block-diagonal weight: diag blocks are w_linear.T (seg_len, d_model).
    wT = w_linear.T.astype(x.dtype)                  # (seg_len, d_model)
    w_bd = jnp.kron(jnp.eye(g, dtype=x.dtype), wT) if g > 1 else wT   # (K, N)

    # --- tile selection: per-generation VMEM budget, big / even grids -------
    Kp = _round_up(K, 128)                           # VMEM lane footprint per row
    Np = _round_up(N, 128)
    w_bytes = _round_up(K, 8) * Np * itemsize
    bytes_per_row = 2 * (Kp + Np) * itemsize         # double-buffered input + output tile
    vmem_cap = _vmem_capacity_bytes()                # 64 MiB (v7x) / 128 MiB (v5e, v6e)
    vmem_budget = (vmem_cap * 3) // 4 - 2 * w_bytes
    tm_vmem = max(8, (vmem_budget // bytes_per_row) // 8 * 8)
    tm = max(8, (min(tm_target, tm_vmem) // 8) * 8)
    if M2 > 4096:
        # aim for >= 4 grid steps (megacore load balance) but keep tiles >= 1024 rows
        tm = min(tm, max(1024, _round_up(pl.cdiv(M2, 4), 8)))
    tm = min(tm, _round_up(M2, 8))
    tm = max(tm, 8)
    grid_m = pl.cdiv(M2, tm)
    if grid_m > 1 and grid_m % 2 == 1:
        # even step count so both TensorCores (v7x) get equal work
        tm_even = _round_up(pl.cdiv(M2, grid_m + 1), 8)
        if tm_even >= 256:
            tm = tm_even
            grid_m = pl.cdiv(M2, tm)

    est_bytes = tm * bytes_per_row + 2 * w_bytes
    vmem_limit = int(min(vmem_cap, max(32 * 1024 * 1024, est_bytes + 8 * 1024 * 1024)))

    out2d = pl.pallas_call(
        _dsw_matmul_kernel,
        out_shape=jax.ShapeDtypeStruct((M2, N), x.dtype),
        grid_spec=pltpu.PrefetchScalarGridSpec(
            num_scalar_prefetch=0,
            grid=(grid_m,),
            in_specs=[
                pl.BlockSpec((tm, K), lambda i: (i, 0)),
                # constant index_map -> weight stays resident; no per-step re-DMA
                pl.BlockSpec((K, N), lambda i: (0, 0)),
            ],
            out_specs=pl.BlockSpec((tm, N), lambda i: (i, 0)),
        ),
        compiler_params=pltpu.CompilerParams(
            dimension_semantics=("parallel",),
            vmem_limit_bytes=vmem_limit,
            # let XLA fuse the transpose/reshape producer into operand 0 (hint only)
            allow_input_fusion=[True, False],
        ),
    )(x2d, w_bd)

    # (M2, g*d_model) -> (b, d, num_groups, g, d_model) -> (b, d, seg_num, d_model)
    out = out2d.reshape(batch, ts_dim, num_groups, g, d_model)
    return out.reshape(batch, ts_dim, seg_num, d_model)


def dsw_embedding_reference(x, w_linear, seg_len, d_model):
    batch, ts_len, ts_dim = x.shape
    seg_num = ts_len // seg_len
    x_seg = x.reshape(batch, seg_num, seg_len, ts_dim)
    x_seg = jnp.transpose(x_seg, (0, 3, 1, 2)).reshape(-1, seg_len)
    out = x_seg @ w_linear.T
    return out.reshape(batch, ts_dim, seg_num, d_model)


if __name__ == "__main__":
    # Small shapes consistent with the module:
    #   seg_len=8, d_model=32, batch=2, ts_dim=4, seg_num=16 -> ts_len=128
    seg_len, d_model = 8, 32
    batch, ts_dim, seg_num = 2, 4, 16
    ts_len = seg_num * seg_len

    key = jax.random.PRNGKey(0)
    kx, kw, kfw = jax.random.split(key, 3)

    x = jax.random.normal(kx, (batch, ts_len, ts_dim), dtype=jnp.float32)

    # Deterministic parameter init (Kaiming-uniform-like bound, as in nn.Linear default).
    bound = 1.0 / math.sqrt(seg_len)
    w_linear = jax.random.uniform(
        kw, (d_model, seg_len), minval=-bound, maxval=bound, dtype=jnp.float32
    )
    # flinear is declared in __init__ but unused in forward; created for parameter parity only.
    fbound = 1.0 / math.sqrt(seg_len // 2 + 1)
    w_flinear = jax.random.uniform(
        kfw, (d_model // 2 + 1, seg_len // 2 + 1),
        minval=-fbound, maxval=fbound, dtype=jnp.float32
    )

    out = dsw_embedding_forward(x, w_linear, seg_len, d_model)
    out = jax.block_until_ready(out)

    ref = dsw_embedding_reference(x, w_linear, seg_len, d_model)
    assert out.shape == (batch, ts_dim, seg_num, d_model), out.shape
    assert jnp.allclose(out, ref, atol=1e-5, rtol=1e-5)

    print("KERNEL_OK")
</pallas_src>

<mosaic_0001>
module attributes {stable_mosaic.version = 11 : i64} {
  func.func @_dsw_matmul_kernel(%arg0: i32, %arg1: memref<8x128xf32, #tpu.memory_space<vmem>>, %arg2: memref<128x512xf32, #tpu.memory_space<vmem>>, %arg3: memref<8x512xf32, #tpu.memory_space<vmem>>) attributes {dimension_semantics = [#tpu.dimension_semantics<parallel>], iteration_bounds = array<i64: 1>, scalar_prefetch = 0 : i64, scratch_operands = 0 : i64, tpu.core_type = #tpu.core_type<tc>, window_params = [{transform_indices = @transform_0, window_bounds = array<i64: 8, 128>}, {pipeline_mode = #tpu.pipeline_mode<synchronous>, transform_indices = @transform_1, window_bounds = array<i64: 128, 512>}, {transform_indices = @transform_2, window_bounds = array<i64: 8, 512>}]} {
    %c0 = arith.constant 0 : index
    %c0_0 = arith.constant 0 : index
    %0 = vector.load %arg1[%c0, %c0_0] : memref<8x128xf32, #tpu.memory_space<vmem>>, vector<8x128xf32>
    %c0_1 = arith.constant 0 : index
    %c0_2 = arith.constant 0 : index
    %1 = vector.load %arg2[%c0_1, %c0_2] : memref<128x512xf32, #tpu.memory_space<vmem>>, vector<128x512xf32>
    %cst = arith.constant dense<0.000000e+00> : vector<8x512xf32>
    %2 = tpu.matmul %0, %1, %cst {dimension_numbers = #tpu.dot_dimension_numbers<[1], [0], [0], [1], [0, 0, 1, 1], [], []>} : vector<8x128xf32>, vector<128x512xf32>, vector<8x512xf32> -> vector<8x512xf32>
    %c0_3 = arith.constant 0 : index
    %c0_4 = arith.constant 0 : index
    %3 = vector.load %arg3[%c0_3, %c0_4] : memref<8x512xf32, #tpu.memory_space<vmem>>, vector<8x512xf32>
    tpu.vector_store %arg3[%c0_3, %c0_4], %2 {strides = array<i32>} : memref<8x512xf32, #tpu.memory_space<vmem>>, vector<8x512xf32>,
    return
  }
  func.func @transform_0(%arg0: i32) -> (i32, i32) {
    %c0_i32 = arith.constant 0 : i32
    %c0_i32_0 = arith.constant 0 : i32
    return %arg0, %c0_i32 : i32, i32
  }
  func.func @transform_1(%arg0: i32) -> (i32, i32) {
    %c0_i32 = arith.constant 0 : i32
    %c0_i32_0 = arith.constant 0 : i32
    %c0_i32_1 = arith.constant 0 : i32
    return %c0_i32, %c0_i32_0 : i32, i32
  }
  func.func @transform_2(%arg0: i32) -> (i32, i32) {
    %c0_i32 = arith.constant 0 : i32
    %c0_i32_0 = arith.constant 0 : i32
    return %arg0, %c0_i32 : i32, i32
  }
}

</mosaic_0001>

<bundles_post_ra>
// kernel: tpu_custom_call.1
= control target key start
LH: loop header
LB: loop body
LE: loop exit
PB: predicated region body
PF: predicated region fallthrough
CT: control target
= control target key end

     0   :  { %7 = vsyncpa [#allocation3], 0  ;;  %s471_s0 = inlined_call_operand.hbm [shape: f32[8,128], index: 0, kind: input, shape index: {}]   ;;  %s472_s1 = inlined_call_operand.hbm [shape: f32[128,512], index: 1, kind: input, shape index: {}]   ;;  %s473_s2 = inlined_call_operand.hbm [shape: f32[8,512], index: 2, kind: output, shape index: {}]  }
   0x1   :  { %8 = vsyncpa [#allocation6], 0 }
   0x2   :  { %9 = vsyncpa [#allocation4], 0  ;;  %s407_s9 = smov [#allocation2]   ;;  %s408_s11 = smov [#allocation5]  }
   0x3   :  { %s16_s10 = sshll.u32 %s407_s9, 4  ;;  %s25_s12 = sshll.u32 %s408_s11, 4  ;;  %s17_s10 = int_to_ptr.vmem [resolvable:$true] %s16_s10  ;;  %s428_s12 = int_to_ptr.vmem [resolvable:$true] %s25_s12 }
   0x4   :  { %s335_s15 = scalar_lea.hbm %s471_s0, 128 }
   0x5   :  { %p336_p0 = scmp.ne.s32.totalorder %s471_s0, %s335_s15  ;;  %p339_p1 = scmp.lt.u32.totalorder %s335_s15, %s471_s0 }
   0x7   :  { %p341_p2 = pnand %p339_p1, %p336_p0 }
   0x9   :  { %344 = shalt.err (!%p341_p2)
}
   0xa   :  { %s345_s20 = scalar_lea.vmem %s17_s10, 128  ;;  %p350_p4 = scmp.lt.s32.totalorder %s17_s10, %s17_s10 }
   0xb   :  { %p346_p3 = scmp.ne.s32.totalorder %s17_s10, %s345_s20  ;;  %p351_p5 = scmp.lt.s32.totalorder %s345_s20, %s345_s20 }
   0xd   :  { %p352_p6 = por %p351_p5, %p350_p4 }
   0xf   :  { %p353_p7 = pnand %p352_p6, %p346_p3 }
  0x11   :  { %356 = shalt.err (!%p353_p7)
}
  0x12   :  { %19 = dma.hbm_to_vmem [thread:$0]  %s471_s0, 128, %s17_s10, [#allocation3]  }
  0x13   :  { %s357_s25 = scalar_lea.hbm %s472_s1, 8192 }
  0x14   :  { %p358_p8 = scmp.ne.s32.totalorder %s472_s1, %s357_s25  ;;  %p361_p9 = scmp.lt.u32.totalorder %s357_s25, %s472_s1 }
  0x16   :  { %p363_p10 = pnand %p361_p9, %p358_p8 }
  0x18   :  { %366 = shalt.err (!%p363_p10)
}
  0x19   :  { %s367_s30 = scalar_lea.vmem %s428_s12, 8192  ;;  %p372_p12 = scmp.lt.s32.totalorder %s428_s12, %s428_s12 }
  0x1a   :  { %p368_p11 = scmp.ne.s32.totalorder %s428_s12, %s367_s30  ;;  %p373_p13 = scmp.lt.s32.totalorder %s367_s30, %s367_s30 }
  0x1c   :  { %p374_p0 = por %p373_p13, %p372_p12 }
  0x1e   :  { %p375_p1 = pnand %p374_p0, %p368_p11 }
  0x20   :  { %378 = shalt.err (!%p375_p1)
}
  0x21   :  { %s409_s0 = smov 512   ;;  %s410_s3 = smov 32  }
  0x22   :  { %31 = dma.hbm_to_vmem [thread:$0]  %s472_s1, 8192, %s428_s12, [#allocation6], %s409_s0, %s409_s0, %s410_s3  }
  0x23   :  { %401 = dma.done.wait [#allocation3], 128  }
  0x24   :  { %402 = vsyncadd [#allocation3], 4294967168 }
  0x25   :  { %403 = dma.done.wait [#allocation6], 8192  }
  0x26   :  { %404 = vsyncadd [#allocation6], 4294959104  ;;  %v411_v0 = vmov 0.0   ;;  %v40_v1 = vld [vmem:[#allocation5 + $0x8] sm:$0xff]  ;;  %v42_v3 = vld [vmem:[#allocation5 + $0x18] sm:$0xff]  ;;  %s412_s1 = smov [#allocation7]  }
  0x27   :  { %167 = vmatprep.mubr.f32.mxu0 %v411_v0  ;;  %238 = vmatprep.mubr.f32.mxu1 %v411_v0  ;;  %v44_v2 = vld [vmem:[#allocation5 + $0x28] sm:$0xff]  ;;  %v46_v5 = vld [vmem:[#allocation5 + $0x38] sm:$0xff]  ;;  %v39_v6 = vld [vmem:[#allocation5] sm:$0xff]  ;;  %s255_s6 = sshll.u32 %s412_s1, 4  ;;  %s256_s6 = int_to_ptr.vmem [resolvable:$true] %s255_s6 }
  0x28   :  { %v265_v4 = vpack.c.bf16 %v44_v2, %v40_v1  ;;  %v43_v7 = vld [vmem:[#allocation5 + $0x20] sm:$0xff]  ;;  %v297_v8 = vpack.c.bf16 %v46_v5, %v42_v3  ;;  %v41_v10 = vld [vmem:[#allocation5 + $0x10] sm:$0xff]  ;;  %v48_v12 = vld [vmem:[#allocation5 + $0x48] sm:$0xff]  ;;  %s379_s7 = scalar_lea.vmem %s256_s6, 512  ;;  %p384_p3 = scmp.lt.s32.totalorder %s256_s6, %s256_s6 }
  0x29   :  { %v267_v9 = vpack.c.bf16 %v43_v7, %v39_v6  ;;  %v45_v11 = vld [vmem:[#allocation5 + $0x30] sm:$0xff]  ;;  %v52_v14 = vld [vmem:[#allocation5 + $0x68] sm:$0xff]  ;;  %v50_v15 = vld [vmem:[#allocation5 + $0x58] sm:$0xff]  ;;  %p380_p2 = scmp.ne.s32.totalorder %s256_s6, %s379_s7  ;;  %p385_p4 = scmp.lt.s32.totalorder %s379_s7, %s379_s7 }
  0x2a   :  { %266 = vmatprep.subr.bf16.mxu0 %v265_v4  ;;  %v299_v13 = vpack.c.bf16 %v45_v11, %v41_v10  ;;  %v54_v16 = vld [vmem:[#allocation5 + $0x78] sm:$0xff]  ;;  %298 = vmatprep.subr.bf16.mxu1 %v297_v8  ;;  %v269_v17 = vpack.c.bf16 %v52_v14, %v48_v12  ;;  %v47_v19 = vld [vmem:[#allocation5 + $0x40] sm:$0xff]  ;;  %v49_v21 = vld [vmem:[#allocation5 + $0x50] sm:$0xff] }
  0x2b   :  { %268 = vmatpush1.bf16.msra.mxu0 %v267_v9  ;;  %v301_v18 = vpack.c.bf16 %v54_v16, %v50_v15  ;;  %v51_v20 = vld [vmem:[#allocation5 + $0x60] sm:$0xff]  ;;  %v53_v23 = vld [vmem:[#allocation5 + $0x70] sm:$0xff]  ;;  %v56_v24 = vld [vmem:[#allocation5 + $0x88] sm:$0xff]  ;;  %p386_p5 = por %p385_p4, %p384_p3 }
  0x2c   :  { %300 = vmatpush1.bf16.msra.mxu1 %v299_v13  ;;  %v271_v22 = vpack.c.bf16 %v51_v20, %v47_v19  ;;  %v60_v25 = vld [vmem:[#allocation5 + $0xa8] sm:$0xff]  ;;  %270 = vmatprep.subr.bf16.mxu0 %v269_v17  ;;  %v303_v26 = vpack.c.bf16 %v53_v23, %v49_v21  ;;  %v58_v28 = vld [vmem:[#allocation5 + $0x98] sm:$0xff]  ;;  %v55_v30 = vld [vmem:[#allocation5 + $0x80] sm:$0xff] }
  0x2d   :  { %302 = vmatprep.subr.bf16.mxu1 %v301_v18  ;;  %v273_v27 = vpack.c.bf16 %v60_v25, %v56_v24  ;;  %v62_v29 = vld [vmem:[#allocation5 + $0xb8] sm:$0xff]  ;;  %v59_v32 = vld [vmem:[#allocation5 + $0xa0] sm:$0xff]  ;;  %v57_v33 = vld [vmem:[#allocation5 + $0x90] sm:$0xff]  ;;  %p387_p6 = pnand %p386_p5, %p380_p2 }
  0x2e   :  { %v305_v31 = vpack.c.bf16 %v62_v29, %v58_v28  ;;  %v61_v34 = vld [vmem:[#allocation5 + $0xb0] sm:$0xff]  ;;  %v275_v35 = vpack.c.bf16 %v59_v32, %v55_v30  ;;  %v64_v36 = vld [vmem:[#allocation5 + $0xc8] sm:$0xff]  ;;  %v66_v38 = vld [vmem:[#allocation5 + $0xd8] sm:$0xff] }
  0x2f   :  { %272 = vmatpush1.bf16.msra.mxu0 %v271_v22  ;;  %v68_v37 = vld [vmem:[#allocation5 + $0xe8] sm:$0xff]  ;;  %v307_v39 = vpack.c.bf16 %v61_v34, %v57_v33  ;;  %v70_v41 = vld [vmem:[#allocation5 + $0xf8] sm:$0xff]  ;;  %v63_v42 = vld [vmem:[#allocation5 + $0xc0] sm:$0xff] }
  0x30   :  { %304 = vmatpush1.bf16.msra.mxu1 %v303_v26  ;;  %274 = vmatprep.subr.bf16.mxu0 %v273_v27  ;;  %v277_v40 = vpack.c.bf16 %v68_v37, %v64_v36  ;;  %v67_v43 = vld [vmem:[#allocation5 + $0xe0] sm:$0xff]  ;;  %v309_v44 = vpack.c.bf16 %v70_v41, %v66_v38  ;;  %v65_v45 = vld [vmem:[#allocation5 + $0xd0] sm:$0xff]  ;;  %v72_v47 = vld [vmem:[#allocation5 + $0x108] sm:$0xff] }
  0x31   :  { %306 = vmatprep.subr.bf16.mxu1 %v305_v31  ;;  %v69_v46 = vld [vmem:[#allocation5 + $0xf0] sm:$0xff]  ;;  %v76_v48 = vld [vmem:[#allocation5 + $0x128] sm:$0xff]  ;;  %v74_v49 = vld [vmem:[#allocation5 + $0x118] sm:$0xff]  ;;  %v279_v51 = vpack.c.bf16 %v67_v43, %v63_v42 }
  0x32   :  { %v78_v50 = vld [vmem:[#allocation5 + $0x138] sm:$0xff]  ;;  %v311_v52 = vpack.c.bf16 %v69_v46, %v65_v45  ;;  %v281_v53 = vpack.c.bf16 %v76_v48, %v72_v47  ;;  %v71_v54 = vld [vmem:[#allocation5 + $0x100] sm:$0xff]  ;;  %v73_v56 = vld [vmem:[#allocation5 + $0x110] sm:$0xff] }
  0x33   :  { %276 = vmatpush1.bf16.msra.mxu0 %v275_v35  ;;  %v75_v55 = vld [vmem:[#allocation5 + $0x120] sm:$0xff]  ;;  %v313_v57 = vpack.c.bf16 %v78_v50, %v74_v49  ;;  %v77_v58 = vld [vmem:[#allocation5 + $0x130] sm:$0xff]  ;;  %v80_v59 = vld [vmem:[#allocation5 + $0x148] sm:$0xff] }
  0x34   :  { %308 = vmatpush1.bf16.msra.mxu1 %v307_v39  ;;  %278 = vmatprep.subr.bf16.mxu0 %v277_v40  ;;  %v84_v60 = vld [vmem:[#allocation5 + $0x168] sm:$0xff]  ;;  %v82_v61 = vld [vmem:[#allocation5 + $0x158] sm:$0xff]  ;;  %v283_v63 = vpack.c.bf16 %v75_v55, %v71_v54  ;;  %v315_v0 = vpack.c.bf16 %v77_v58, %v73_v56  ;;  %v79_v2 = vld [vmem:[#allocation5 + $0x140] sm:$0xff] }
  0x35   :  { %310 = vmatprep.subr.bf16.mxu1 %v309_v44  ;;  %v86_v62 = vld [vmem:[#allocation5 + $0x178] sm:$0xff]  ;;  %v285_v1 = vpack.c.bf16 %v84_v60, %v80_v59  ;;  %v83_v3 = vld [vmem:[#allocation5 + $0x160] sm:$0xff]  ;;  %v81_v4 = vld [vmem:[#allocation5 + $0x150] sm:$0xff] }
  0x36   :  { %v317_v5 = vpack.c.bf16 %v86_v62, %v82_v61  ;;  %v85_v6 = vld [vmem:[#allocation5 + $0x170] sm:$0xff]  ;;  %v88_v7 = vld [vmem:[#allocation5 + $0x188] sm:$0xff]  ;;  %v90_v9 = vld [vmem:[#allocation5 + $0x198] sm:$0xff]  ;;  %v287_v11 = vpack.c.bf16 %v83_v3, %v79_v2 }
  0x37   :  { %280 = vmatpush1.bf16.msra.mxu0 %v279_v51  ;;  %v92_v8 = vld [vmem:[#allocation5 + $0x1a8] sm:$0xff]  ;;  %v94_v10 = vld [vmem:[#allocation5 + $0x1b8] sm:$0xff]  ;;  %v319_v12 = vpack.c.bf16 %v85_v6, %v81_v4  ;;  %v87_v14 = vld [vmem:[#allocation5 + $0x180] sm:$0xff] }
  0x38   :  { %312 = vmatpush1.bf16.msra.mxu1 %v311_v52  ;;  %282 = vmatprep.subr.bf16.mxu0 %v281_v53  ;;  %v289_v13 = vpack.c.bf16 %v92_v8, %v88_v7  ;;  %v91_v15 = vld [vmem:[#allocation5 + $0x1a0] sm:$0xff]  ;;  %v89_v16 = vld [vmem:[#allocation5 + $0x190] sm:$0xff]  ;;  %v321_v17 = vpack.c.bf16 %v94_v10, %v90_v9  ;;  %v96_v19 = vld [vmem:[#allocation5 + $0x1c8] sm:$0xff] }
  0x39   :  { %314 = vmatprep.subr.bf16.mxu1 %v313_v57  ;;  %v93_v18 = vld [vmem:[#allocation5 + $0x1b0] sm:$0xff]  ;;  %v100_v20 = vld [vmem:[#allocation5 + $0x1e8] sm:$0xff]  ;;  %v98_v21 = vld [vmem:[#allocation5 + $0x1d8] sm:$0xff]  ;;  %v291_v23 = vpack.c.bf16 %v91_v15, %v87_v14 }
  0x3a   :  { %v102_v22 = vld [vmem:[#allocation5 + $0x1f8] sm:$0xff]  ;;  %v323_v24 = vpack.c.bf16 %v93_v18, %v89_v16  ;;  %v293_v25 = vpack.c.bf16 %v100_v20, %v96_v19  ;;  %v95_v26 = vld [vmem:[#allocation5 + $0x1c0] sm:$0xff]  ;;  %v97_v29 = vld [vmem:[#allocation5 + $0x1d0] sm:$0xff] }
  0x3b   :  { %284 = vmatpush1.bf16.msra.mxu0 %v283_v63  ;;  %v99_v27 = vld [vmem:[#allocation5 + $0x1e0] sm:$0xff]  ;;  %v325_v28 = vpack.c.bf16 %v102_v22, %v98_v21  ;;  %v101_v30 = vld [vmem:[#allocation5 + $0x1f0] sm:$0xff]  ;;  %v38_v33 = vld [vmem:[#allocation2] sm:$0xff] }
  0x3c   :  { %316 = vmatpush1.bf16.msra.mxu1 %v315_v0  ;;  %286 = vmatprep.subr.bf16.mxu0 %v285_v1  ;;  %v295_v31 = vpack.c.bf16 %v99_v27, %v95_v26  ;;  %v327_v32 = vpack.c.bf16 %v101_v30, %v97_v29 }
  0x3d   :  { %318 = vmatprep.subr.bf16.mxu1 %v317_v5 }
  0x3f   :  { %288 = vmatpush1.bf16.msra.mxu0 %v287_v11 }
  0x40   :  { %320 = vmatpush1.bf16.msra.mxu1 %v319_v12  ;;  %290 = vmatprep.subr.bf16.mxu0 %v289_v13 }
  0x41   :  { %322 = vmatprep.subr.bf16.mxu1 %v321_v17 }
  0x43   :  { %292 = vmatpush1.bf16.msra.mxu0 %v291_v23 }
  0x44   :  { %324 = vmatpush1.bf16.msra.mxu1 %v323_v24  ;;  %294 = vmatprep.subr.bf16.mxu0 %v293_v25 }
  0x45   :  { %326 = vmatprep.subr.bf16.mxu1 %v325_v28 }
  0x47   :  { %296 = vmatpush1.bf16.msra.mxu0 %v295_v31 }
  0x48   :  { %328 = vmatpush1.bf16.msra.mxu1 %v327_v32 }
  0x4a   :  { %168 = vmatmul.mubr.f32.vlgmr.msra.gmra.mrb[0].mxu0 %v38_v33 }
  0x4b   :  { %239 = vmatmul.mubr.f32.vlgmr.msra.gmra.mrb[0].mxu1 %v38_v33 }
 0x11d   :  { %v169_v34 = vpop.f32.mrb[0].mxu0 }
 0x11e   :  { %245 = vst [vmem:[#allocation7] sm:$0xff] %v169_v34  ;;  %v240_v35 = vpop.f32.mrb[0].mxu1  ;;  %v171_v36 = vpop.f32.mrb[1].mxu0 }
 0x11f   :  { %247 = vst [vmem:[#allocation7 + $0x10] sm:$0xff] %v240_v35  ;;  %246 = vst [vmem:[#allocation7 + $0x8] sm:$0xff] %v171_v36  ;;  %v242_v37 = vpop.f32.mrb[1].mxu1 }
 0x120   :  { %248 = vst [vmem:[#allocation7 + $0x18] sm:$0xff] %v242_v37 }
 0x121   :  { %390 = shalt.err (!%p387_p6)
}
 0x122   :  { %s391_s10 = scalar_lea.hbm %s473_s2, 512 }
 0x123   :  { %p392_p7 = scmp.ne.s32.totalorder %s473_s2, %s391_s10  ;;  %p395_p8 = scmp.lt.u32.totalorder %s391_s10, %s473_s2 }
 0x125   :  { %p397_p9 = pnand %p395_p8, %p392_p7 }
 0x127   :  { %400 = shalt.err (!%p397_p9)
}
 0x128   :  { %258 = dma.vmem_to_hbm [thread:$0]  %s256_s6, 512, %s473_s2, [#allocation4]  }
 0x129   :  { %405 = dma.done.wait [#allocation4], 512  }
 0x12a   :  { %406 = vsyncadd [#allocation4], 4294966784 }
 0x12b   :  { %262 = vsyncpa [#allocation3], 1 }
 0x12c   :  { %263 = vsyncpa [#allocation6], 1 }
 0x12d   :  { %264 = vsyncpa [#allocation4], 1 }

</bundles_post_ra>
